<compile_context>
chip_gen: v7x
topology: tpu7x:2x2x1
jax: 0.10.0
libtpu: 0.0.40
codegen_flags: <defaults>
</compile_context>

<pallas_src>
import math

import numpy as np
import jax
import jax.numpy as jnp
from jax.experimental import pallas as pl
from jax.experimental.pallas import tpu as pltpu

_LANE = 128             # TPU lane width
_KP = 4                 # per-sample input columns: [x, y, z, 1.0 (cos-bias)]
_G_MAX = 8              # max samples packed per output row (bounds MXU K = 4*G <= 32)
_MAX_PACK_LANES = 4096  # cap on packed lane width (bounds resident SEL size in VMEM)


def _derive_channels(org_channels: int) -> int:
    channels = int(np.ceil(org_channels / 6) * 2)
    if channels % 2:
        channels += 1
    return channels


def _packing(org_channels: int):
    """Pick (G, P): G samples packed per output row, P = lane-padded row width."""
    w = int(org_channels)
    g_exact = _LANE // math.gcd(w, _LANE)          # smallest G with G*w % 128 == 0
    if g_exact <= _G_MAX and g_exact * w <= _MAX_PACK_LANES:
        g = g_exact                                # zero lane padding
    elif w < _LANE:
        g = max(1, min(_G_MAX, _LANE // w))        # best-effort packing, small padding
    else:
        g = 1                                      # wide rows: padding < 128 lanes
    p = ((g * w + _LANE - 1) // _LANE) * _LANE
    return g, p


def _build_sel(org_channels: int, g: int, p: int) -> np.ndarray:
    """SEL (G*4, P):  phase = packed_[x,y,z,1] @ SEL;  emb = sin(phase).

    Sample slot gg, output column c (< org_channels), lane l = gg*org_channels + c:
      d = c // channels selects the coordinate, j = (c % channels) // 2 the frequency,
      SEL[gg*4 + d, l] = inv_freq[j];  SEL[gg*4 + 3, l] = pi/2 on "cos" lanes
      (bias column folds cos(x) = sin(x + pi/2) into the matmul).
    The crop to org_channels is baked in: lanes beyond the packed samples stay zero.
    """
    channels = _derive_channels(org_channels)
    inv_freq = (1.0 / (10000.0 ** (np.arange(0, channels, 2, dtype=np.float64)
                                   / channels))).astype(np.float32)
    w = org_channels
    sel = np.zeros((g * _KP, p), dtype=np.float32)
    for gg in range(g):
        for c in range(w):
            d, r = divmod(c, channels)
            lane = gg * w + c
            sel[gg * _KP + d, lane] = inv_freq[r // 2]
            if r % 2:
                sel[gg * _KP + 3, lane] = np.float32(np.pi / 2.0)
    return sel


def penc3d_kernel(xin_ref, sel_ref, out_ref):
    """One row tile: MXU computes phases (freq select + pi/2 cos bias), single fused sin."""
    phase = jnp.dot(xin_ref[...], sel_ref[...], preferred_element_type=jnp.float32)
    out_ref[...] = jnp.sin(phase).astype(out_ref.dtype)


def positional_encoding_3d(batch: int, xyz: jnp.ndarray, org_channels: int,
                           tile_rows: int | None = None,
                           out_dtype=jnp.float32) -> jnp.ndarray:
    """JAX/Pallas equivalent of PositionalEncoding3D(org_channels).forward(batch, xyz).

    out_dtype=jnp.bfloat16 halves HBM writeback on the write-bandwidth-bound v5e/v6e if the
    consumer tolerates it; default float32 matches the PyTorch module exactly.
    """
    assert xyz.shape == (batch, 3)
    w = int(org_channels)
    g, p = _packing(w)
    k_in = g * _KP
    sel = jnp.asarray(_build_sel(w, g, p))

    n_rows = pl.cdiv(batch, g)                     # packed output rows actually needed

    # VMEM-budgeted row tile: ~2x out (double buffer) + phase intermediate + 2x input.
    if tile_rows is None:
        budget = 16 * 1024 * 1024
        per_row = 4 * (3 * p + 2 * k_in)
        tile_rows = budget // per_row
    tile_rows = max(8, (int(tile_rows) // 8) * 8)
    tile_rows = min(tile_rows, max(8, ((n_rows + 7) // 8) * 8), 2048)

    grid = (pl.cdiv(n_rows, tile_rows),)
    n_rows_in = grid[0] * tile_rows                # input rows padded to full tiles

    # Host-side glue on a tiny array (batch x 4 floats): append bias, pad, pack G per row.
    xyz1 = jnp.concatenate(
        [xyz.astype(jnp.float32), jnp.ones((batch, 1), jnp.float32)], axis=1)
    xyz1 = jnp.pad(xyz1, ((0, n_rows_in * g - batch), (0, 0)))   # padded rows: bias 0 -> sin(0)=0
    packed_in = xyz1.reshape(n_rows_in, k_in)

    cost = pl.CostEstimate(
        flops=int(2 * n_rows_in * k_in * p),
        transcendentals=int(n_rows_in * p),
        bytes_accessed=int(4 * (n_rows_in * k_in + k_in * p)
                           + n_rows * p * jnp.dtype(out_dtype).itemsize),
    )

    out = pl.pallas_call(
        penc3d_kernel,
        out_shape=jax.ShapeDtypeStruct((n_rows, p), out_dtype),
        grid=grid,
        in_specs=[
            pl.BlockSpec((tile_rows, k_in), lambda i: (i, 0)),
            pl.BlockSpec((k_in, p), lambda i: (0, 0)),
        ],
        out_specs=pl.BlockSpec((tile_rows, p), lambda i: (i, 0)),
        compiler_params=pltpu.CompilerParams(
            dimension_semantics=("parallel",),     # batch-tile axis; shards across v7x's 2 TCs
            vmem_limit_bytes=48 * 1024 * 1024,
        ),
        cost_estimate=cost,
    )(packed_in, sel)

    # Glue: unpack G samples per row.  reshape is a free metadata op when P == G*W; the row
    # slice only copies when batch % G != 0 (contiguous, size batch*W).
    if p != g * w:
        out = out[:, :g * w]
    out = out.reshape(n_rows * g, w)
    if n_rows * g != batch:
        out = out[:batch]
    return out


def _reference(xyz, org_channels):
    """Pure-JAX reference mirroring the PyTorch forward exactly."""
    channels = _derive_channels(org_channels)
    inv_freq = 1.0 / (10000.0 ** (jnp.arange(0, channels, 2, dtype=jnp.float32) / channels))
    x, y, z = xyz[:, 0], xyz[:, 1], xyz[:, 2]

    def get_emb(sin_inp):
        e = jnp.stack((jnp.sin(sin_inp), jnp.cos(sin_inp)), axis=-1)
        return e.reshape(sin_inp.shape[0], -1)

    emb_x = get_emb(jnp.einsum('i,j->ij', x, inv_freq))
    emb_y = get_emb(jnp.einsum('i,j->ij', y, inv_freq))
    emb_z = get_emb(jnp.einsum('i,j->ij', z, inv_freq))
    emb = jnp.concatenate([emb_x, emb_y, emb_z], axis=-1)
    return emb[:, :org_channels]


if __name__ == "__main__":
    key = jax.random.PRNGKey(0)

    # Small example consistent with the module's forward(batch, xyz); org_channels=32.
    org_channels = 32
    batch = 8
    xyz = jax.random.uniform(key, (batch, 3), dtype=jnp.float32, minval=-4.0, maxval=4.0)
    out = jax.block_until_ready(positional_encoding_3d(batch, xyz, org_channels))
    ref = _reference(xyz, org_channels)
    assert out.shape == (batch, org_channels), out.shape
    assert out.dtype == jnp.float32
    np.testing.assert_allclose(np.asarray(out), np.asarray(ref), rtol=1e-5, atol=1e-5)

    # Multi-step grid + batch not a multiple of the packing factor (exercises the row slice).
    batch2 = 50
    xyz2 = jax.random.uniform(jax.random.PRNGKey(1), (batch2, 3), dtype=jnp.float32,
                              minval=-4.0, maxval=4.0)
    out2 = jax.block_until_ready(
        positional_encoding_3d(batch2, xyz2, org_channels, tile_rows=8))
    ref2 = _reference(xyz2, org_channels)
    np.testing.assert_allclose(np.asarray(out2), np.asarray(ref2), rtol=1e-5, atol=1e-5)

    # Channel count needing the fallback packing path (lane padding, P != G*W).
    org3, batch3 = 20, 17
    xyz3 = jax.random.uniform(jax.random.PRNGKey(2), (batch3, 3), dtype=jnp.float32,
                              minval=-4.0, maxval=4.0)
    out3 = jax.block_until_ready(positional_encoding_3d(batch3, xyz3, org3))
    ref3 = _reference(xyz3, org3)
    np.testing.assert_allclose(np.asarray(out3), np.asarray(ref3), rtol=1e-5, atol=1e-5)

    print("KERNEL_OK")
</pallas_src>

<mosaic_0001>
module attributes {stable_mosaic.version = 11 : i64} {
  func.func @penc3d_kernel(%arg0: i32, %arg1: memref<8x16xf32, #tpu.memory_space<vmem>>, %arg2: memref<16x128xf32, #tpu.memory_space<vmem>>, %arg3: memref<8x128xf32, #tpu.memory_space<vmem>>) attributes {dimension_semantics = [#tpu.dimension_semantics<parallel>], iteration_bounds = array<i64: 1>, scalar_prefetch = 0 : i64, scratch_operands = 0 : i64, tpu.core_type = #tpu.core_type<tc>, window_params = [{transform_indices = @transform_0, window_bounds = array<i64: 8, 16>}, {pipeline_mode = #tpu.pipeline_mode<synchronous>, transform_indices = @transform_1, window_bounds = array<i64: 16, 128>}, {transform_indices = @transform_2, window_bounds = array<i64: 8, 128>}]} {
    %c0 = arith.constant 0 : index
    %c0_0 = arith.constant 0 : index
    %0 = vector.load %arg1[%c0, %c0_0] : memref<8x16xf32, #tpu.memory_space<vmem>>, vector<8x16xf32>
    %c0_1 = arith.constant 0 : index
    %c0_2 = arith.constant 0 : index
    %1 = vector.load %arg2[%c0_1, %c0_2] : memref<16x128xf32, #tpu.memory_space<vmem>>, vector<16x128xf32>
    %cst = arith.constant dense<0.000000e+00> : vector<8x128xf32>
    %2 = tpu.matmul %0, %1, %cst {dimension_numbers = #tpu.dot_dimension_numbers<[1], [0], [0], [1], [0, 0, 1, 1], [], []>} : vector<8x16xf32>, vector<16x128xf32>, vector<8x128xf32> -> vector<8x128xf32>
    %3 = math.sin %2 : vector<8x128xf32>
    %c0_3 = arith.constant 0 : index
    %c0_4 = arith.constant 0 : index
    %4 = vector.load %arg3[%c0_3, %c0_4] : memref<8x128xf32, #tpu.memory_space<vmem>>, vector<8x128xf32>
    tpu.vector_store %arg3[%c0_3, %c0_4], %3 {strides = array<i32>} : memref<8x128xf32, #tpu.memory_space<vmem>>, vector<8x128xf32>,
    return
  }
  func.func @transform_0(%arg0: i32) -> (i32, i32) {
    %c0_i32 = arith.constant 0 : i32
    %c0_i32_0 = arith.constant 0 : i32
    return %arg0, %c0_i32 : i32, i32
  }
  func.func @transform_1(%arg0: i32) -> (i32, i32) {
    %c0_i32 = arith.constant 0 : i32
    %c0_i32_0 = arith.constant 0 : i32
    %c0_i32_1 = arith.constant 0 : i32
    return %c0_i32, %c0_i32_0 : i32, i32
  }
  func.func @transform_2(%arg0: i32) -> (i32, i32) {
    %c0_i32 = arith.constant 0 : i32
    %c0_i32_0 = arith.constant 0 : i32
    return %arg0, %c0_i32 : i32, i32
  }
}

</mosaic_0001>

<bundles_post_ra>
// kernel: tpu_custom_call.1
= control target key start
LH: loop header
LB: loop body
LE: loop exit
PB: predicated region body
PF: predicated region fallthrough
CT: control target
= control target key end

     0   :  { %7 = vsyncpa [#allocation3], 0  ;;  %s447_s0 = inlined_call_operand.hbm [shape: f32[8,16], index: 0, kind: input, shape index: {}]   ;;  %s448_s1 = inlined_call_operand.hbm [shape: f32[16,128], index: 1, kind: input, shape index: {}]   ;;  %s449_s2 = inlined_call_operand.hbm [shape: f32[2,128], index: 2, kind: output, shape index: {}]  }
   0x1   :  { %8 = vsyncpa [#allocation6], 0 }
   0x2   :  { %9 = vsyncpa [#allocation4], 0  ;;  %s352_s9 = smov [#allocation2]   ;;  %s353_s11 = smov [#allocation5]  }
   0x3   :  { %s16_s10 = sshll.u32 %s352_s9, 4  ;;  %s25_s12 = sshll.u32 %s353_s11, 4  ;;  %s17_s10 = int_to_ptr.vmem [resolvable:$true] %s16_s10  ;;  %s383_s12 = int_to_ptr.vmem [resolvable:$true] %s25_s12 }
   0x4   :  { %s280_s15 = scalar_lea.hbm %s447_s0, 128 }
   0x5   :  { %p281_p0 = scmp.ne.s32.totalorder %s447_s0, %s280_s15  ;;  %p284_p1 = scmp.lt.u32.totalorder %s280_s15, %s447_s0 }
   0x7   :  { %p286_p2 = pnand %p284_p1, %p281_p0 }
   0x9   :  { %289 = shalt.err (!%p286_p2)
}
   0xa   :  { %s290_s20 = scalar_lea.vmem %s17_s10, 128  ;;  %p295_p4 = scmp.lt.s32.totalorder %s17_s10, %s17_s10 }
   0xb   :  { %p291_p3 = scmp.ne.s32.totalorder %s17_s10, %s290_s20  ;;  %p296_p5 = scmp.lt.s32.totalorder %s290_s20, %s290_s20 }
   0xd   :  { %p297_p6 = por %p296_p5, %p295_p4 }
   0xf   :  { %p298_p7 = pnand %p297_p6, %p291_p3 }
  0x11   :  { %301 = shalt.err (!%p298_p7)
}
  0x12   :  { %19 = dma.hbm_to_vmem [thread:$0]  %s447_s0, 128, %s17_s10, [#allocation3]  }
  0x13   :  { %s302_s25 = scalar_lea.hbm %s448_s1, 256 }
  0x14   :  { %p303_p8 = scmp.ne.s32.totalorder %s448_s1, %s302_s25  ;;  %p306_p9 = scmp.lt.u32.totalorder %s302_s25, %s448_s1 }
  0x16   :  { %p308_p10 = pnand %p306_p9, %p303_p8 }
  0x18   :  { %311 = shalt.err (!%p308_p10)
}
  0x19   :  { %s312_s30 = scalar_lea.vmem %s383_s12, 256  ;;  %p317_p12 = scmp.lt.s32.totalorder %s383_s12, %s383_s12 }
  0x1a   :  { %p313_p11 = scmp.ne.s32.totalorder %s383_s12, %s312_s30  ;;  %p318_p13 = scmp.lt.s32.totalorder %s312_s30, %s312_s30 }
  0x1c   :  { %p319_p0 = por %p318_p13, %p317_p12 }
  0x1e   :  { %p320_p1 = pnand %p319_p0, %p313_p11 }
  0x20   :  { %323 = shalt.err (!%p320_p1)
}
  0x21   :  { %s354_s0 = smov 128   ;;  %s355_s3 = smov 8  }
  0x22   :  { %31 = dma.hbm_to_vmem [thread:$0]  %s448_s1, 256, %s383_s12, [#allocation6], %s354_s0, %s354_s0, %s355_s3  }
  0x23   :  { %346 = dma.done.wait [#allocation3], 128  }
  0x24   :  { %347 = vsyncadd [#allocation3], 4294967168 }
  0x25   :  { %348 = dma.done.wait [#allocation6], 256  }
  0x26   :  { %349 = vsyncadd [#allocation6], 4294967040  ;;  %v356_v0 = vmov 0.0|0.0   ;;  %vm357_vm0 = vmmov 0   ;;  %v358_v1 = vmov 0.0   ;;  %v39_v2 = vld [vmem:[#allocation5] sm:$0xff] }
  0x27   :  { %253 = vmatprep.subr.bf16.mxu0 %v356_v0  ;;  %250 = vmatprep.mubr.msk.f32.mxu0 %vm357_vm0, %v358_v1  ;;  %v40_v3 = vld [vmem:[#allocation5 + $0x8] sm:$0xff]  ;;  %v38_v5 = vld [vmem:[#allocation2] sm:$0xff]  ;;  %vm41_vm1 = vcmask 130048   ;;  %v359_v18 = vmov 683565275  }
  0x28   :  { %v254_v4 = vpack.c.bf16 %v40_v3, %v39_v2  ;;  %v360_v20 = vmov 2475754826   ;;  %v361_v23 = vmov 2131351028   ;;  %v362_v26 = vmov 2102212464  }
  0x29   :  { %v363_v29 = vmov 920167782   ;;  %v364_v32 = vmov 1326507024  }
  0x2a   :  { %255 = vmatpush3.bf16.msra.mxu0 %v254_v4 }
  0x2d   :  { %251 = vmatmul.mubr.msk.f32.vlgmr.msra.gmra.mrb[0].mxu0 %vm41_vm1, %v38_v5 }
 0x100   :  { %v414_v6 = vpop.f32.mrb[0].mxu0 }
 0x101   :  { %v118_v7 = vand.u32 2139095040, %v414_v6  ;;  %v252_v8 = vpop.f32.mrb[1].mxu0  ;;  %v115_v12 = vand.u32 2147483647, %v414_v6  ;;  %vm117_vm9 = vcmp.lt.s32.totalorder %v414_v6, 0  ;;  %vm207_vm14 = vweird.f32 %v414_v6 }
 0x103   :  { %v119_v9 = vshrl.u32 %v118_v7, 23  ;;  %v122_v15 = vand.u32 8388607, %v115_v12  ;;  %vm116_vm10 = vcmp.le.f32.partialorder %v115_v12, 0.7853982 }
 0x105   :  { %v239_v10 = vadd.s32 4294967169, %v119_v9  ;;  %v123_v34 = vor.u32 8388608, %v122_v15 }
 0x107   :  { %v125_v11 = vadd.s32 1, %v239_v10  ;;  %v163_v48 = vshll.u32 %v123_v34, 8 }
 0x109   :  { %vm126_vm2 = vcmp.gt.s32.totalorder %v125_v11, 0 }
 0x10a   :  { %v127_v13 = vsel %vm126_vm2, %v125_v11, 0 }
 0x10b   :  { %v129_v14 = vand.u32 31, %v127_v13  ;;  %v128_v17 = vshrl.u32 %v127_v13, 5 }
 0x10d   :  { %v130_v16 = vsub.s32 32, %v129_v14  ;;  %v132_v19 = vshll.u32 %v359_v18, %v129_v14  ;;  %v135_v21 = vshll.u32 %v360_v20, %v129_v14  ;;  %v138_v25 = vshll.u32 %v361_v23, %v129_v14 }
 0x10e   :  { %v141_v28 = vshll.u32 %v362_v26, %v129_v14  ;;  %v144_v31 = vshll.u32 %v363_v29, %v129_v14  ;;  %vm147_vm3 = vcmp.lt.s32.totalorder %v128_v17, 1  ;;  %vm150_vm4 = vcmp.lt.s32.totalorder %v128_v17, 4 }
 0x10f   :  { %v133_v22 = vshrl.u32 %v360_v20, %v130_v16  ;;  %v136_v24 = vshrl.u32 %v361_v23, %v130_v16  ;;  %v139_v27 = vshrl.u32 %v362_v26, %v130_v16  ;;  %v142_v30 = vshrl.u32 %v363_v29, %v130_v16 }
 0x110   :  { %v145_v33 = vshrl.u32 %v364_v32, %v130_v16  ;;  %v131_v43 = vshrl.u32 %v359_v18, %v130_v16  ;;  %vm149_vm5 = vcmp.lt.s32.totalorder %v128_v17, 3  ;;  %vm148_vm6 = vcmp.lt.s32.totalorder %v128_v17, 2 }
 0x111   :  { %v134_v35 = vor.u32 %v133_v22, %v132_v19  ;;  %v137_v36 = vor.u32 %v136_v24, %v135_v21  ;;  %v140_v37 = vor.u32 %v139_v27, %v138_v25  ;;  %v143_v38 = vor.u32 %v142_v30, %v141_v28 }
 0x112   :  { %v146_v39 = vor.u32 %v145_v33, %v144_v31 }
 0x113   :  { %v152_v40 = vsel %vm150_vm4, %v140_v37, 2102212464  ;;  %v155_v41 = vsel %vm147_vm3, %v134_v35, %v137_v36  ;;  %v159_v42 = vsel %vm147_vm3, %v137_v36, %v140_v37  ;;  %v156_v44 = vsel %vm150_vm4, %v143_v38, 920167782 }
 0x114   :  { %v160_v45 = vsel %vm150_vm4, %v146_v39, 1326507024  ;;  %v157_v46 = vsel %vm149_vm5, %v140_v37, %v156_v44  ;;  %v151_v49 = vsel %vm147_vm3, %v131_v43, %v134_v35  ;;  %v153_v50 = vsel %vm149_vm5, %v137_v36, %v152_v40 }
 0x115   :  { %v161_v47 = vsel %vm149_vm5, %v143_v38, %v160_v45  ;;  %v158_v51 = vsel %vm148_vm6, %v155_v41, %v157_v46  ;;  %v154_v57 = vsel %vm148_vm6, %v151_v49, %v153_v50 }
 0x116   :  { %v162_v52 = vsel %vm148_vm6, %v159_v42, %v161_v47  ;;  %v423_v55 = vmul.u32.u64.low %v163_v48, %v158_v51  ;;  %v424_v56 = vmul.u32.u64.high %v163_v48, %v158_v51, %v423_v55  ;;  %v170_v59 = vmul.u32 %v163_v48, %v154_v57 }
 0x117   :  { %v420_v53 = vmul.u32.u64.low %v163_v48, %v162_v52  ;;  %v421_v54 = vmul.u32.u64.high %v163_v48, %v162_v52, %v420_v53 }
 0x118   :  { %v173_v58 = vadd.s32 1, %v424_v56 }
 0x119   :  { %vm172_vm7 = vc.u32 %v421_v54, %v423_v55  ;;  %v171_v8 = vadd.s32 %v423_v55, %v421_v54 }
 0x11a   :  { %v174_v60 = vsel %vm172_vm7, %v173_v58, %v424_v56 }
 0x11b   :  { %v175_v61 = vadd.s32 %v174_v60, %v170_v59 }
 0x11d   :  { %v176_v62 = vadd.s32 536870912, %v175_v61 }
 0x11f   :  { %v177_v63 = vshrl.u32 %v176_v62, 30 }
 0x121   :  { %v178_v0 = vshll.u32 %v177_v63, 30  ;;  %v201_v21 = vsub.s32 4, %v177_v63 }
 0x123   :  { %v179_v1 = vsub.s32 %v175_v61, %v178_v0  ;;  %v202_v24 = vsel %vm117_vm9, %v201_v21, %v177_v63 }
 0x124   :  { %v204_v26 = vsel %vm116_vm10, 0, %v202_v24 }
 0x125   :  { %v181_v2 = vsub.s32 0, %v179_v1  ;;  %v208_v27 = vadd.s32 3, %v204_v26 }
 0x127   :  { %v240_v3 = vmin.u32 %v181_v2, %v179_v1  ;;  %v209_v28 = vand.u32 3, %v208_v27 }
 0x129   :  { %v183_v4 = vclz %v240_v3  ;;  %vm214_vm11 = vcmp.eq.s32.totalorder %v209_v28, 2  ;;  %vm211_vm12 = vcmp.eq.s32.totalorder %v209_v28, 0  ;;  %vm210_vm13 = vcmp.lt.s32.totalorder %v209_v28, 2 }
 0x12b   :  { %v241_v5 = vadd.s32 4294967294, %v183_v4 }
 0x12d   :  { %vm242_vm8 = vcmp.lt.s32.totalorder %v241_v5, 0 }
 0x12e   :  { %v186_v7 = vsel %vm242_vm8, 0, %v241_v5 }
 0x12f   :  { %v187_v9 = vsub.s32 32, %v186_v7  ;;  %v191_v10 = vsub.s32 4294967266, %v186_v7  ;;  %v188_v11 = vshll.u32 %v179_v1, %v186_v7 }
 0x131   :  { %v189_v13 = vshrl.u32 %v171_v8, %v187_v9  ;;  %v192_v14 = vadd.s32 127, %v191_v10 }
 0x133   :  { %v190_v15 = vor.u32 %v189_v13, %v188_v11  ;;  %v193_v16 = vshll.u32 %v192_v14, 23 }
 0x135   :  { %v194_v17 = vor.u32 4788187, %v193_v16  ;;  %v197_v19 = vcvt.s32.f32 %v190_v15 }
 0x137   :  { %v195_v18 = vand.u32 2147483647, %v194_v17 }
 0x139   :  { %v198_v20 = vmul.f32 %v197_v19, %v195_v18 }
 0x13b   :  { %v199_v22 = vxor.u32 2147483648, %v198_v20 }
 0x13d   :  { %v200_v23 = vsel %vm117_vm9, %v199_v22, %v198_v20 }
 0x13e   :  { %v203_v25 = vsel %vm116_vm10, %v414_v6, %v200_v23 }
 0x13f   :  { %276 = vcosq.f32 %v203_v25 }
 0x140   :  { %278 = vsinq.f32 %v203_v25 }
 0x149   :  { %v277_v29 = vpop.eup %276 }
 0x14a   :  { %v279_v30 = vpop.eup %278  ;;  %v215_v31 = vxor.u32 2147483648, %v277_v29 }
 0x14b   :  { %v212_v32 = vxor.u32 2147483648, %v279_v30 }
 0x14c   :  { %v216_v33 = vsel %vm214_vm11, %v215_v31, %v279_v30 }
 0x14d   :  { %v213_v34 = vsel %vm211_vm12, %v277_v29, %v212_v32 }
 0x14e   :  { %v217_v12 = vsel %vm210_vm13, %v213_v34, %v216_v33 }
 0x14f   :  { %v218_v35 = vsel %vm207_vm14, nan, %v217_v12 }
 0x150   :  { %219 = vst [vmem:[#allocation7] sm:$0xff] %v218_v35 }
 0x151   :  { %224 = vsyncadd [#allocation4], 96  ;;  %s365_s1 = smov [#allocation7]  }
 0x152   :  { %s225_s6 = sshll.u32 %s365_s1, 4  ;;  %s226_s6 = int_to_ptr.vmem [resolvable:$true] %s225_s6 }
 0x153   :  { %s324_s7 = scalar_lea.vmem %s226_s6, 32  ;;  %s328_s8 = scalar_lea.vmem %s226_s6, 128 }
 0x154   :  { %p325_p2 = scmp.ne.s32.totalorder %s226_s6, %s324_s7  ;;  %p329_p3 = scmp.lt.s32.totalorder %s226_s6, %s226_s6 }
 0x155   :  { %p330_p4 = scmp.lt.s32.totalorder %s328_s8, %s324_s7 }
 0x157   :  { %p331_p5 = por %p330_p4, %p329_p3 }
 0x159   :  { %p332_p6 = pnand %p331_p5, %p325_p2 }
 0x15b   :  { %335 = shalt.err (!%p332_p6)
}
 0x15c   :  { %s336_s11 = scalar_lea.hbm %s449_s2, 32 }
 0x15d   :  { %p337_p7 = scmp.ne.s32.totalorder %s449_s2, %s336_s11  ;;  %p340_p8 = scmp.lt.u32.totalorder %s336_s11, %s449_s2 }
 0x15f   :  { %p342_p9 = pnand %p340_p8, %p337_p7 }
 0x161   :  { %345 = shalt.err (!%p342_p9)
}
 0x162   :  { %s366_s16 = smov 32   ;;  %s367_s17 = smov 2  }
 0x163   :  { %231 = dma.vmem_to_hbm [thread:$0]  %s226_s6, 32, %s449_s2, [#allocation4], %s366_s16, %s366_s16, %s367_s17  }
 0x164   :  { %350 = dma.done.wait [#allocation4], 128  }
 0x165   :  { %351 = vsyncadd [#allocation4], 4294967168 }
 0x166   :  { %235 = vsyncpa [#allocation3], 1 }
 0x167   :  { %236 = vsyncpa [#allocation6], 1 }
 0x168   :  { %237 = vsyncpa [#allocation4], 1 }

</bundles_post_ra>
